<compile_context>
chip_gen: v7x
topology: tpu7x:2x2x1
jax: 0.10.0
libtpu: 0.0.40
codegen_flags: <defaults>
</compile_context>

<pallas_src>
import functools

import jax
import jax.numpy as jnp
import numpy as np
from jax.experimental import pallas as pl
from jax.experimental.pallas import tpu as pltpu


# ---------------------------------------------------------------------------
# Fused kernel: prop_steps x (edge MLP + scatter-add + LSTMCell) + readout
# ---------------------------------------------------------------------------
def _fused_kernel(x0_ref, ea_ref, gd_ref, gs_ref, nmask_ref,
                  w1i_ref, w1j_ref, w1e_ref, b1_ref, w2_ref, b2_ref,
                  wih_ref, whh_ref, bl_ref,
                  wrd_ref, brd_ref,
                  out_ref, *, prop_steps, hidden, gpad):
    H = hidden

    # One-hot gather matrices (exact 0/1 values) stored bf16; widen once.
    gd = gd_ref[...].astype(jnp.float32)          # [Ep, Np]  rows -> dst node
    gs = gs_ref[...].astype(jnp.float32)          # [Ep, Np]  rows -> src node
    gdt = gd.T                                    # [Np, Ep]  scatter-add matrix
    ea = ea_ref[...]                              # [Ep, De]

    x = x0_ref[...]                               # [Np, H] node state
    c = jnp.zeros_like(x)                         # [Np, H] cell state

    # Fully unrolled propagation loop (P is tiny; weights already resident).
    for step in range(prop_steps):
        # ---- MPN message: project nodes first (associativity), then gather.
        xw_i = jnp.dot(x, w1i_ref[step], preferred_element_type=jnp.float32)
        xw_j = jnp.dot(x, w1j_ref[step], preferred_element_type=jnp.float32)
        h = (jnp.dot(gd, xw_i, preferred_element_type=jnp.float32)
             + jnp.dot(gs, xw_j, preferred_element_type=jnp.float32)
             + jnp.dot(ea, w1e_ref[step], preferred_element_type=jnp.float32)
             + b1_ref[step])                                      # [Ep, H]
        h = jnp.maximum(h, 0.0)
        m = (jnp.dot(h, w2_ref[step], preferred_element_type=jnp.float32)
             + b2_ref[step])                                      # [Ep, H]
        # ---- scatter-add to target nodes: a = Gd^T @ m (no scat array).
        a = jnp.dot(gdt, m, preferred_element_type=jnp.float32)   # [Np, H]

        # ---- LSTMCell: input=x, hidden=a, cell=c; gates fused to [N, 4H].
        z = (jnp.dot(x, wih_ref[step], preferred_element_type=jnp.float32)
             + jnp.dot(a, whh_ref[step], preferred_element_type=jnp.float32)
             + bl_ref[step])                                      # [Np, 4H=128]
        lane = jax.lax.broadcasted_iota(jnp.int32, z.shape, 1)
        is_g = (lane >= 2 * H) & (lane < 3 * H)                   # tanh block
        act = jnp.where(is_g, jnp.tanh(z), jax.nn.sigmoid(z))     # dense EUP
        i_g = act[:, 0 * H:1 * H]
        f_g = act[:, 1 * H:2 * H]
        g_g = act[:, 2 * H:3 * H]
        o_g = act[:, 3 * H:4 * H]
        c = f_g * c + i_g * g_g
        x = o_g * jnp.tanh(c)

    # ---- fused gated readout: one [H, 2*Gpad] matmul, 256-lane output.
    z = (jnp.dot(x, wrd_ref[...], preferred_element_type=jnp.float32)
         + brd_ref[...])                                          # [Np, 2*Gpad]
    g = jax.nn.sigmoid(z[:, :gpad])
    f = z[:, gpad:]
    # Mask out padded node rows, reduce over nodes -> [1, Gpad] (lane-dense).
    out_ref[...] = jnp.sum(nmask_ref[...] * g * f, axis=0, keepdims=True)


# ---------------------------------------------------------------------------
# Wrapper (jit'ed; prop_steps static)
# ---------------------------------------------------------------------------
@functools.partial(jax.jit, static_argnums=(4,))
def graph_representation_forward(x, edge_attr, edge_index, params, prop_steps):
    N, H = x.shape
    E, De = edge_attr.shape
    G = params["wg"].shape[1]
    Gpad = pl.cdiv(G, 128) * 128
    Npad = pl.cdiv(N, 8) * 8
    Epad = pl.cdiv(E, 8) * 8

    src = edge_index[0]                           # x_j (source)
    dst = edge_index[1]                           # x_i (target), aggr target
    # One-hot gather matrices; 0/1 values are exact in bf16 (half the VMEM/DMA).
    Gd = jnp.pad(jax.nn.one_hot(dst, Npad, dtype=jnp.bfloat16),
                 ((0, Epad - E), (0, 0)))         # [Epad, Npad]
    Gs = jnp.pad(jax.nn.one_hot(src, Npad, dtype=jnp.bfloat16),
                 ((0, Epad - E), (0, 0)))         # [Epad, Npad]
    eap = jnp.pad(edge_attr, ((0, Epad - E), (0, 0)))
    x0p = jnp.pad(x, ((0, Npad - N), (0, 0)))
    nmask = (jnp.arange(Npad) < N).astype(jnp.float32)[:, None]   # [Npad, 1]

    padG = Gpad - G
    wrd = jnp.concatenate([jnp.pad(params["wg"], ((0, 0), (0, padG))),
                           jnp.pad(params["wf"], ((0, 0), (0, padG)))], axis=1)
    brd = jnp.concatenate([jnp.pad(params["bg"], ((0, 0), (0, padG))),
                           jnp.pad(params["bf"], ((0, 0), (0, padG)))], axis=1)

    vmem = pl.BlockSpec(memory_space=pltpu.MemorySpace.VMEM)
    out = pl.pallas_call(
        functools.partial(_fused_kernel, prop_steps=prop_steps,
                          hidden=H, gpad=Gpad),
        out_shape=jax.ShapeDtypeStruct((1, Gpad), jnp.float32),
        in_specs=[vmem] * 16,
        out_specs=vmem,
    )(x0p, eap, Gd, Gs, nmask,
      params["w1i"], params["w1j"], params["w1e"], params["b1"],
      params["w2"], params["b2"],
      params["wih"], params["whh"], params["bl"],
      wrd, brd)
    return out[0, :G]


# ---------------------------------------------------------------------------
# Pure-JAX reference (for correctness check)
# ---------------------------------------------------------------------------
def reference_forward(x, edge_attr, edge_index, params, prop_steps):
    N, H = x.shape
    c = jnp.zeros_like(x)
    src, dst = edge_index[0], edge_index[1]
    for i in range(prop_steps):
        xi, xj = x[dst], x[src]
        h = jax.nn.relu(xi @ params["w1i"][i] + xj @ params["w1j"][i]
                        + edge_attr @ params["w1e"][i] + params["b1"][i])
        m = h @ params["w2"][i] + params["b2"][i]
        a = jnp.zeros((N, H), jnp.float32).at[dst].add(m)
        z = x @ params["wih"][i] + a @ params["whh"][i] + params["bl"][i]
        i_g = jax.nn.sigmoid(z[:, 0 * H:1 * H])
        f_g = jax.nn.sigmoid(z[:, 1 * H:2 * H])
        g_g = jnp.tanh(z[:, 2 * H:3 * H])
        o_g = jax.nn.sigmoid(z[:, 3 * H:4 * H])
        c = f_g * c + i_g * g_g
        x = o_g * jnp.tanh(c)
    g = jax.nn.sigmoid(x @ params["wg"] + params["bg"])
    f = x @ params["wf"] + params["bf"]
    return jnp.sum(g * f, axis=0)


# ---------------------------------------------------------------------------
# Deterministic parameter init (shapes per the PyTorch module __init__,
# stored pre-split / stacked / gate-fused for the kernel)
# ---------------------------------------------------------------------------
def init_params(key, node_dim, edge_dim, graph_dim, prop_steps):
    def rnd(k, shape):
        return jax.random.normal(k, shape, jnp.float32) * 0.1

    keys = jax.random.split(key, 16)
    H, De, P = node_dim, edge_dim, prop_steps
    return {
        # MPN fe = Linear(2H+De,H) -> ReLU -> Linear(H,H); first weight split
        # into the x_i / x_j / edge_attr column blocks.
        "w1i": rnd(keys[0], (P, H, H)),
        "w1j": rnd(keys[1], (P, H, H)),
        "w1e": rnd(keys[2], (P, De, H)),
        "b1":  rnd(keys[3], (P, 1, H)),
        "w2":  rnd(keys[4], (P, H, H)),
        "b2":  rnd(keys[5], (P, 1, H)),
        # LSTMCell weights, gates fused along columns in PyTorch order i|f|g|o
        # (weight_ih.T / weight_hh.T); bias = b_ih + b_hh combined.
        "wih": rnd(keys[6], (P, H, 4 * H)),
        "whh": rnd(keys[7], (P, H, 4 * H)),
        "bl":  rnd(keys[8], (P, 1, 4 * H)),
        # readout gm / fm
        "wg":  rnd(keys[9], (H, graph_dim)),
        "bg":  rnd(keys[10], (1, graph_dim)),
        "wf":  rnd(keys[11], (H, graph_dim)),
        "bf":  rnd(keys[12], (1, graph_dim)),
    }


if __name__ == "__main__":
    NODE_DIM = 32
    EDGE_DIM = 16
    GRAPH_DIM = 50
    PROP_STEPS = 2
    N_NODES = 12
    N_EDGES = 24

    key = jax.random.PRNGKey(0)
    kx, ke, ki, kp = jax.random.split(key, 4)

    x = jax.random.normal(kx, (N_NODES, NODE_DIM), jnp.float32)
    edge_attr = jax.random.normal(ke, (N_EDGES, EDGE_DIM), jnp.float32)
    edge_index = jax.random.randint(ki, (2, N_EDGES), 0, N_NODES, dtype=jnp.int32)

    params = init_params(kp, NODE_DIM, EDGE_DIM, GRAPH_DIM, PROP_STEPS)

    h_G = graph_representation_forward(x, edge_attr, edge_index, params,
                                       PROP_STEPS)
    h_G = jax.block_until_ready(h_G)

    h_G_ref = reference_forward(x, edge_attr, edge_index, params, PROP_STEPS)
    h_G_ref = jax.block_until_ready(h_G_ref)

    assert h_G.shape == (GRAPH_DIM,)
    np.testing.assert_allclose(np.asarray(h_G), np.asarray(h_G_ref),
                               rtol=1e-4, atol=1e-4)
    print("KERNEL_OK")
</pallas_src>

<mosaic_0001>
module attributes {stable_mosaic.version = 11 : i64} {
  func.func @_fused_kernel(%arg0: memref<16x32xf32, #tpu.memory_space<vmem>>, %arg1: memref<24x16xf32, #tpu.memory_space<vmem>>, %arg2: memref<24x16xbf16, #tpu.memory_space<vmem>>, %arg3: memref<24x16xbf16, #tpu.memory_space<vmem>>, %arg4: memref<16x1xf32, #tpu.memory_space<vmem>>, %arg5: memref<2x32x32xf32, #tpu.memory_space<vmem>>, %arg6: memref<2x32x32xf32, #tpu.memory_space<vmem>>, %arg7: memref<2x16x32xf32, #tpu.memory_space<vmem>>, %arg8: memref<2x1x32xf32, #tpu.memory_space<vmem>>, %arg9: memref<2x32x32xf32, #tpu.memory_space<vmem>>, %arg10: memref<2x1x32xf32, #tpu.memory_space<vmem>>, %arg11: memref<2x32x128xf32, #tpu.memory_space<vmem>>, %arg12: memref<2x32x128xf32, #tpu.memory_space<vmem>>, %arg13: memref<2x1x128xf32, #tpu.memory_space<vmem>>, %arg14: memref<32x256xf32, #tpu.memory_space<vmem>>, %arg15: memref<1x256xf32, #tpu.memory_space<vmem>>, %arg16: memref<1x128xf32, #tpu.memory_space<vmem>>) attributes {dimension_semantics = [], scalar_prefetch = 0 : i64, scratch_operands = 0 : i64, tpu.core_type = #tpu.core_type<tc>} {
    %c0 = arith.constant 0 : index
    %c0_0 = arith.constant 0 : index
    %0 = vector.load %arg2[%c0, %c0_0] : memref<24x16xbf16, #tpu.memory_space<vmem>>, vector<24x16xbf16>
    %1 = arith.extf %0 : vector<24x16xbf16> to vector<24x16xf32>
    %c0_1 = arith.constant 0 : index
    %c0_2 = arith.constant 0 : index
    %2 = vector.load %arg3[%c0_1, %c0_2] : memref<24x16xbf16, #tpu.memory_space<vmem>>, vector<24x16xbf16>
    %3 = arith.extf %2 : vector<24x16xbf16> to vector<24x16xf32>
    %4 = tpu.transpose %1, [1, 0] : vector<24x16xf32> -> vector<16x24xf32>
    %c0_3 = arith.constant 0 : index
    %c0_4 = arith.constant 0 : index
    %5 = vector.load %arg1[%c0_3, %c0_4] : memref<24x16xf32, #tpu.memory_space<vmem>>, vector<24x16xf32>
    %c0_5 = arith.constant 0 : index
    %c0_6 = arith.constant 0 : index
    %6 = vector.load %arg0[%c0_5, %c0_6] : memref<16x32xf32, #tpu.memory_space<vmem>>, vector<16x32xf32>
    %cst = arith.constant 0.000000e+00 : f32
    %7 = vector.broadcast %cst : f32 to vector<16x32xf32>
    %c0_7 = arith.constant 0 : index
    %c0_8 = arith.constant 0 : index
    %c0_9 = arith.constant 0 : index
    %8 = vector.load %arg5[%c0_7, %c0_8, %c0_9] : memref<2x32x32xf32, #tpu.memory_space<vmem>>, vector<1x32x32xf32>
    %9 = vector.shape_cast %8 : vector<1x32x32xf32> to vector<32x32xf32>
    %cst_10 = arith.constant dense<0.000000e+00> : vector<16x32xf32>
    %10 = tpu.matmul %6, %9, %cst_10 {dimension_numbers = #tpu.dot_dimension_numbers<[1], [0], [0], [1], [0, 0, 1, 1], [], []>} : vector<16x32xf32>, vector<32x32xf32>, vector<16x32xf32> -> vector<16x32xf32>
    %c0_11 = arith.constant 0 : index
    %c0_12 = arith.constant 0 : index
    %c0_13 = arith.constant 0 : index
    %11 = vector.load %arg6[%c0_11, %c0_12, %c0_13] : memref<2x32x32xf32, #tpu.memory_space<vmem>>, vector<1x32x32xf32>
    %12 = vector.shape_cast %11 : vector<1x32x32xf32> to vector<32x32xf32>
    %cst_14 = arith.constant dense<0.000000e+00> : vector<16x32xf32>
    %13 = tpu.matmul %6, %12, %cst_14 {dimension_numbers = #tpu.dot_dimension_numbers<[1], [0], [0], [1], [0, 0, 1, 1], [], []>} : vector<16x32xf32>, vector<32x32xf32>, vector<16x32xf32> -> vector<16x32xf32>
    %cst_15 = arith.constant dense<0.000000e+00> : vector<24x32xf32>
    %14 = tpu.matmul %1, %10, %cst_15 {dimension_numbers = #tpu.dot_dimension_numbers<[1], [0], [0], [1], [0, 0, 1, 1], [], []>} : vector<24x16xf32>, vector<16x32xf32>, vector<24x32xf32> -> vector<24x32xf32>
    %cst_16 = arith.constant dense<0.000000e+00> : vector<24x32xf32>
    %15 = tpu.matmul %3, %13, %cst_16 {dimension_numbers = #tpu.dot_dimension_numbers<[1], [0], [0], [1], [0, 0, 1, 1], [], []>} : vector<24x16xf32>, vector<16x32xf32>, vector<24x32xf32> -> vector<24x32xf32>
    %16 = arith.addf %14, %15 : vector<24x32xf32>
    %c0_17 = arith.constant 0 : index
    %c0_18 = arith.constant 0 : index
    %c0_19 = arith.constant 0 : index
    %17 = vector.load %arg7[%c0_17, %c0_18, %c0_19] : memref<2x16x32xf32, #tpu.memory_space<vmem>>, vector<1x16x32xf32>
    %18 = vector.shape_cast %17 : vector<1x16x32xf32> to vector<16x32xf32>
    %cst_20 = arith.constant dense<0.000000e+00> : vector<24x32xf32>
    %19 = tpu.matmul %5, %18, %cst_20 {dimension_numbers = #tpu.dot_dimension_numbers<[1], [0], [0], [1], [0, 0, 1, 1], [], []>} : vector<24x16xf32>, vector<16x32xf32>, vector<24x32xf32> -> vector<24x32xf32>
    %20 = arith.addf %16, %19 : vector<24x32xf32>
    %c0_21 = arith.constant 0 : index
    %c0_22 = arith.constant 0 : index
    %c0_23 = arith.constant 0 : index
    %21 = vector.load %arg8[%c0_21, %c0_22, %c0_23] : memref<2x1x32xf32, #tpu.memory_space<vmem>>, vector<1x1x32xf32>
    %22 = vector.shape_cast %21 : vector<1x1x32xf32> to vector<1x32xf32>
    %23 = vector.broadcast %22 : vector<1x32xf32> to vector<24x32xf32>
    %24 = arith.addf %20, %23 : vector<24x32xf32>
    %cst_24 = arith.constant 0.000000e+00 : f32
    %25 = vector.broadcast %cst_24 : f32 to vector<24x32xf32>
    %26 = arith.maximumf %24, %25 : vector<24x32xf32>
    %c0_25 = arith.constant 0 : index
    %c0_26 = arith.constant 0 : index
    %c0_27 = arith.constant 0 : index
    %27 = vector.load %arg9[%c0_25, %c0_26, %c0_27] : memref<2x32x32xf32, #tpu.memory_space<vmem>>, vector<1x32x32xf32>
    %28 = vector.shape_cast %27 : vector<1x32x32xf32> to vector<32x32xf32>
    %cst_28 = arith.constant dense<0.000000e+00> : vector<24x32xf32>
    %29 = tpu.matmul %26, %28, %cst_28 {dimension_numbers = #tpu.dot_dimension_numbers<[1], [0], [0], [1], [0, 0, 1, 1], [], []>} : vector<24x32xf32>, vector<32x32xf32>, vector<24x32xf32> -> vector<24x32xf32>
    %c0_29 = arith.constant 0 : index
    %c0_30 = arith.constant 0 : index
    %c0_31 = arith.constant 0 : index
    %30 = vector.load %arg10[%c0_29, %c0_30, %c0_31] : memref<2x1x32xf32, #tpu.memory_space<vmem>>, vector<1x1x32xf32>
    %31 = vector.shape_cast %30 : vector<1x1x32xf32> to vector<1x32xf32>
    %32 = vector.broadcast %31 : vector<1x32xf32> to vector<24x32xf32>
    %33 = arith.addf %29, %32 : vector<24x32xf32>
    %cst_32 = arith.constant dense<0.000000e+00> : vector<16x32xf32>
    %34 = tpu.matmul %4, %33, %cst_32 {dimension_numbers = #tpu.dot_dimension_numbers<[1], [0], [0], [1], [0, 0, 1, 1], [], []>} : vector<16x24xf32>, vector<24x32xf32>, vector<16x32xf32> -> vector<16x32xf32>
    %c0_33 = arith.constant 0 : index
    %c0_34 = arith.constant 0 : index
    %c0_35 = arith.constant 0 : index
    %35 = vector.load %arg11[%c0_33, %c0_34, %c0_35] : memref<2x32x128xf32, #tpu.memory_space<vmem>>, vector<1x32x128xf32>
    %36 = vector.shape_cast %35 : vector<1x32x128xf32> to vector<32x128xf32>
    %cst_36 = arith.constant dense<0.000000e+00> : vector<16x128xf32>
    %37 = tpu.matmul %6, %36, %cst_36 {dimension_numbers = #tpu.dot_dimension_numbers<[1], [0], [0], [1], [0, 0, 1, 1], [], []>} : vector<16x32xf32>, vector<32x128xf32>, vector<16x128xf32> -> vector<16x128xf32>
    %c0_37 = arith.constant 0 : index
    %c0_38 = arith.constant 0 : index
    %c0_39 = arith.constant 0 : index
    %38 = vector.load %arg12[%c0_37, %c0_38, %c0_39] : memref<2x32x128xf32, #tpu.memory_space<vmem>>, vector<1x32x128xf32>
    %39 = vector.shape_cast %38 : vector<1x32x128xf32> to vector<32x128xf32>
    %cst_40 = arith.constant dense<0.000000e+00> : vector<16x128xf32>
    %40 = tpu.matmul %34, %39, %cst_40 {dimension_numbers = #tpu.dot_dimension_numbers<[1], [0], [0], [1], [0, 0, 1, 1], [], []>} : vector<16x32xf32>, vector<32x128xf32>, vector<16x128xf32> -> vector<16x128xf32>
    %41 = arith.addf %37, %40 : vector<16x128xf32>
    %c0_41 = arith.constant 0 : index
    %c0_42 = arith.constant 0 : index
    %c0_43 = arith.constant 0 : index
    %42 = vector.load %arg13[%c0_41, %c0_42, %c0_43] : memref<2x1x128xf32, #tpu.memory_space<vmem>>, vector<1x1x128xf32>
    %43 = vector.shape_cast %42 : vector<1x1x128xf32> to vector<1x128xf32>
    %44 = vector.broadcast %43 : vector<1x128xf32> to vector<16x128xf32>
    %45 = arith.addf %41, %44 : vector<16x128xf32>
    %46 = tpu.iota {dimensions = array<i32: 1>} : vector<16x128xi32>
    %c64_i32 = arith.constant 64 : i32
    %47 = vector.broadcast %c64_i32 : i32 to vector<16x128xi32>
    %48 = arith.cmpi sge, %46, %47 : vector<16x128xi32>
    %c96_i32 = arith.constant 96 : i32
    %49 = vector.broadcast %c96_i32 : i32 to vector<16x128xi32>
    %50 = arith.cmpi slt, %46, %49 : vector<16x128xi32>
    %51 = arith.andi %48, %50 : vector<16x128xi1>
    %52 = math.tanh %45 : vector<16x128xf32>
    %53 = arith.negf %45 : vector<16x128xf32>
    %54 = math.exp %53 : vector<16x128xf32>
    %cst_44 = arith.constant 1.000000e+00 : f32
    %55 = vector.broadcast %cst_44 : f32 to vector<16x128xf32>
    %56 = arith.addf %55, %54 : vector<16x128xf32>
    %57 = arith.divf %55, %56 : vector<16x128xf32>
    %58 = arith.select %51, %52, %57 : vector<16x128xi1>, vector<16x128xf32>
    %59 = vector.extract_strided_slice %58 {offsets = [0, 0], sizes = [16, 32], strides = [1, 1]} : vector<16x128xf32> to vector<16x32xf32>
    %60 = vector.extract_strided_slice %58 {offsets = [0, 32], sizes = [16, 32], strides = [1, 1]} : vector<16x128xf32> to vector<16x32xf32>
    %61 = vector.extract_strided_slice %58 {offsets = [0, 64], sizes = [16, 32], strides = [1, 1]} : vector<16x128xf32> to vector<16x32xf32>
    %62 = vector.extract_strided_slice %58 {offsets = [0, 96], sizes = [16, 32], strides = [1, 1]} : vector<16x128xf32> to vector<16x32xf32>
    %63 = arith.mulf %60, %7 : vector<16x32xf32>
    %64 = arith.mulf %59, %61 : vector<16x32xf32>
    %65 = arith.addf %63, %64 : vector<16x32xf32>
    %66 = math.tanh %65 : vector<16x32xf32>
    %67 = arith.mulf %62, %66 : vector<16x32xf32>
    %c1 = arith.constant 1 : index
    %c0_45 = arith.constant 0 : index
    %c0_46 = arith.constant 0 : index
    %68 = vector.load %arg5[%c1, %c0_45, %c0_46] : memref<2x32x32xf32, #tpu.memory_space<vmem>>, vector<1x32x32xf32>
    %69 = vector.shape_cast %68 : vector<1x32x32xf32> to vector<32x32xf32>
    %cst_47 = arith.constant dense<0.000000e+00> : vector<16x32xf32>
    %70 = tpu.matmul %67, %69, %cst_47 {dimension_numbers = #tpu.dot_dimension_numbers<[1], [0], [0], [1], [0, 0, 1, 1], [], []>} : vector<16x32xf32>, vector<32x32xf32>, vector<16x32xf32> -> vector<16x32xf32>
    %c1_48 = arith.constant 1 : index
    %c0_49 = arith.constant 0 : index
    %c0_50 = arith.constant 0 : index
    %71 = vector.load %arg6[%c1_48, %c0_49, %c0_50] : memref<2x32x32xf32, #tpu.memory_space<vmem>>, vector<1x32x32xf32>
    %72 = vector.shape_cast %71 : vector<1x32x32xf32> to vector<32x32xf32>
    %cst_51 = arith.constant dense<0.000000e+00> : vector<16x32xf32>
    %73 = tpu.matmul %67, %72, %cst_51 {dimension_numbers = #tpu.dot_dimension_numbers<[1], [0], [0], [1], [0, 0, 1, 1], [], []>} : vector<16x32xf32>, vector<32x32xf32>, vector<16x32xf32> -> vector<16x32xf32>
    %cst_52 = arith.constant dense<0.000000e+00> : vector<24x32xf32>
    %74 = tpu.matmul %1, %70, %cst_52 {dimension_numbers = #tpu.dot_dimension_numbers<[1], [0], [0], [1], [0, 0, 1, 1], [], []>} : vector<24x16xf32>, vector<16x32xf32>, vector<24x32xf32> -> vector<24x32xf32>
    %cst_53 = arith.constant dense<0.000000e+00> : vector<24x32xf32>
    %75 = tpu.matmul %3, %73, %cst_53 {dimension_numbers = #tpu.dot_dimension_numbers<[1], [0], [0], [1], [0, 0, 1, 1], [], []>} : vector<24x16xf32>, vector<16x32xf32>, vector<24x32xf32> -> vector<24x32xf32>
    %76 = arith.addf %74, %75 : vector<24x32xf32>
    %c1_54 = arith.constant 1 : index
    %c0_55 = arith.constant 0 : index
    %c0_56 = arith.constant 0 : index
    %77 = vector.load %arg7[%c1_54, %c0_55, %c0_56] : memref<2x16x32xf32, #tpu.memory_space<vmem>>, vector<1x16x32xf32>
    %78 = vector.shape_cast %77 : vector<1x16x32xf32> to vector<16x32xf32>
    %cst_57 = arith.constant dense<0.000000e+00> : vector<24x32xf32>
    %79 = tpu.matmul %5, %78, %cst_57 {dimension_numbers = #tpu.dot_dimension_numbers<[1], [0], [0], [1], [0, 0, 1, 1], [], []>} : vector<24x16xf32>, vector<16x32xf32>, vector<24x32xf32> -> vector<24x32xf32>
    %80 = arith.addf %76, %79 : vector<24x32xf32>
    %c1_58 = arith.constant 1 : index
    %c0_59 = arith.constant 0 : index
    %c0_60 = arith.constant 0 : index
    %81 = vector.load %arg8[%c1_58, %c0_59, %c0_60] : memref<2x1x32xf32, #tpu.memory_space<vmem>>, vector<1x1x32xf32>
    %82 = vector.shape_cast %81 : vector<1x1x32xf32> to vector<1x32xf32>
    %83 = vector.broadcast %82 : vector<1x32xf32> to vector<24x32xf32>
    %84 = arith.addf %80, %83 : vector<24x32xf32>
    %cst_61 = arith.constant 0.000000e+00 : f32
    %85 = vector.broadcast %cst_61 : f32 to vector<24x32xf32>
    %86 = arith.maximumf %84, %85 : vector<24x32xf32>
    %c1_62 = arith.constant 1 : index
    %c0_63 = arith.constant 0 : index
    %c0_64 = arith.constant 0 : index
    %87 = vector.load %arg9[%c1_62, %c0_63, %c0_64] : memref<2x32x32xf32, #tpu.memory_space<vmem>>, vector<1x32x32xf32>
    %88 = vector.shape_cast %87 : vector<1x32x32xf32> to vector<32x32xf32>
    %cst_65 = arith.constant dense<0.000000e+00> : vector<24x32xf32>
    %89 = tpu.matmul %86, %88, %cst_65 {dimension_numbers = #tpu.dot_dimension_numbers<[1], [0], [0], [1], [0, 0, 1, 1], [], []>} : vector<24x32xf32>, vector<32x32xf32>, vector<24x32xf32> -> vector<24x32xf32>
    %c1_66 = arith.constant 1 : index
    %c0_67 = arith.constant 0 : index
    %c0_68 = arith.constant 0 : index
    %90 = vector.load %arg10[%c1_66, %c0_67, %c0_68] : memref<2x1x32xf32, #tpu.memory_space<vmem>>, vector<1x1x32xf32>
    %91 = vector.shape_cast %90 : vector<1x1x32xf32> to vector<1x32xf32>
    %92 = vector.broadcast %91 : vector<1x32xf32> to vector<24x32xf32>
    %93 = arith.addf %89, %92 : vector<24x32xf32>
    %cst_69 = arith.constant dense<0.000000e+00> : vector<16x32xf32>
    %94 = tpu.matmul %4, %93, %cst_69 {dimension_numbers = #tpu.dot_dimension_numbers<[1], [0], [0], [1], [0, 0, 1, 1], [], []>} : vector<16x24xf32>, vector<24x32xf32>, vector<16x32xf32> -> vector<16x32xf32>
    %c1_70 = arith.constant 1 : index
    %c0_71 = arith.constant 0 : index
    %c0_72 = arith.constant 0 : index
    %95 = vector.load %arg11[%c1_70, %c0_71, %c0_72] : memref<2x32x128xf32, #tpu.memory_space<vmem>>, vector<1x32x128xf32>
    %96 = vector.shape_cast %95 : vector<1x32x128xf32> to vector<32x128xf32>
    %cst_73 = arith.constant dense<0.000000e+00> : vector<16x128xf32>
    %97 = tpu.matmul %67, %96, %cst_73 {dimension_numbers = #tpu.dot_dimension_numbers<[1], [0], [0], [1], [0, 0, 1, 1], [], []>} : vector<16x32xf32>, vector<32x128xf32>, vector<16x128xf32> -> vector<16x128xf32>
    %c1_74 = arith.constant 1 : index
    %c0_75 = arith.constant 0 : index
    %c0_76 = arith.constant 0 : index
    %98 = vector.load %arg12[%c1_74, %c0_75, %c0_76] : memref<2x32x128xf32, #tpu.memory_space<vmem>>, vector<1x32x128xf32>
    %99 = vector.shape_cast %98 : vector<1x32x128xf32> to vector<32x128xf32>
    %cst_77 = arith.constant dense<0.000000e+00> : vector<16x128xf32>
    %100 = tpu.matmul %94, %99, %cst_77 {dimension_numbers = #tpu.dot_dimension_numbers<[1], [0], [0], [1], [0, 0, 1, 1], [], []>} : vector<16x32xf32>, vector<32x128xf32>, vector<16x128xf32> -> vector<16x128xf32>
    %101 = arith.addf %97, %100 : vector<16x128xf32>
    %c1_78 = arith.constant 1 : index
    %c0_79 = arith.constant 0 : index
    %c0_80 = arith.constant 0 : index
    %102 = vector.load %arg13[%c1_78, %c0_79, %c0_80] : memref<2x1x128xf32, #tpu.memory_space<vmem>>, vector<1x1x128xf32>
    %103 = vector.shape_cast %102 : vector<1x1x128xf32> to vector<1x128xf32>
    %104 = vector.broadcast %103 : vector<1x128xf32> to vector<16x128xf32>
    %105 = arith.addf %101, %104 : vector<16x128xf32>
    %106 = tpu.iota {dimensions = array<i32: 1>} : vector<16x128xi32>
    %c64_i32_81 = arith.constant 64 : i32
    %107 = vector.broadcast %c64_i32_81 : i32 to vector<16x128xi32>
    %108 = arith.cmpi sge, %106, %107 : vector<16x128xi32>
    %c96_i32_82 = arith.constant 96 : i32
    %109 = vector.broadcast %c96_i32_82 : i32 to vector<16x128xi32>
    %110 = arith.cmpi slt, %106, %109 : vector<16x128xi32>
    %111 = arith.andi %108, %110 : vector<16x128xi1>
    %112 = math.tanh %105 : vector<16x128xf32>
    %113 = arith.negf %105 : vector<16x128xf32>
    %114 = math.exp %113 : vector<16x128xf32>
    %cst_83 = arith.constant 1.000000e+00 : f32
    %115 = vector.broadcast %cst_83 : f32 to vector<16x128xf32>
    %116 = arith.addf %115, %114 : vector<16x128xf32>
    %117 = arith.divf %115, %116 : vector<16x128xf32>
    %118 = arith.select %111, %112, %117 : vector<16x128xi1>, vector<16x128xf32>
    %119 = vector.extract_strided_slice %118 {offsets = [0, 0], sizes = [16, 32], strides = [1, 1]} : vector<16x128xf32> to vector<16x32xf32>
    %120 = vector.extract_strided_slice %118 {offsets = [0, 32], sizes = [16, 32], strides = [1, 1]} : vector<16x128xf32> to vector<16x32xf32>
    %121 = vector.extract_strided_slice %118 {offsets = [0, 64], sizes = [16, 32], strides = [1, 1]} : vector<16x128xf32> to vector<16x32xf32>
    %122 = vector.extract_strided_slice %118 {offsets = [0, 96], sizes = [16, 32], strides = [1, 1]} : vector<16x128xf32> to vector<16x32xf32>
    %123 = arith.mulf %120, %65 : vector<16x32xf32>
    %124 = arith.mulf %119, %121 : vector<16x32xf32>
    %125 = arith.addf %123, %124 : vector<16x32xf32>
    %126 = math.tanh %125 : vector<16x32xf32>
    %127 = arith.mulf %122, %126 : vector<16x32xf32>
    %c0_84 = arith.constant 0 : index
    %c0_85 = arith.constant 0 : index
    %128 = vector.load %arg14[%c0_84, %c0_85] : memref<32x256xf32, #tpu.memory_space<vmem>>, vector<32x256xf32>
    %cst_86 = arith.constant dense<0.000000e+00> : vector<16x256xf32>
    %129 = tpu.matmul %127, %128, %cst_86 {dimension_numbers = #tpu.dot_dimension_numbers<[1], [0], [0], [1], [0, 0, 1, 1], [], []>} : vector<16x32xf32>, vector<32x256xf32>, vector<16x256xf32> -> vector<16x256xf32>
    %c0_87 = arith.constant 0 : index
    %c0_88 = arith.constant 0 : index
    %130 = vector.load %arg15[%c0_87, %c0_88] : memref<1x256xf32, #tpu.memory_space<vmem>>, vector<1x256xf32>
    %131 = vector.broadcast %130 : vector<1x256xf32> to vector<16x256xf32>
    %132 = arith.addf %129, %131 : vector<16x256xf32>
    %133 = vector.extract_strided_slice %132 {offsets = [0, 0], sizes = [16, 128], strides = [1, 1]} : vector<16x256xf32> to vector<16x128xf32>
    %134 = arith.negf %133 : vector<16x128xf32>
    %135 = math.exp %134 : vector<16x128xf32>
    %cst_89 = arith.constant 1.000000e+00 : f32
    %136 = vector.broadcast %cst_89 : f32 to vector<16x128xf32>
    %137 = arith.addf %136, %135 : vector<16x128xf32>
    %138 = arith.divf %136, %137 : vector<16x128xf32>
    %139 = vector.extract_strided_slice %132 {offsets = [0, 128], sizes = [16, 128], strides = [1, 1]} : vector<16x256xf32> to vector<16x128xf32>
    %c0_90 = arith.constant 0 : index
    %c0_91 = arith.constant 0 : index
    %140 = vector.load %arg4[%c0_90, %c0_91] : memref<16x1xf32, #tpu.memory_space<vmem>>, vector<16x1xf32>
    %141 = vector.broadcast %140 : vector<16x1xf32> to vector<16x128xf32>
    %142 = arith.mulf %141, %138 : vector<16x128xf32>
    %143 = arith.mulf %142, %139 : vector<16x128xf32>
    %cst_92 = arith.constant dense<0.000000e+00> : vector<128xf32>
    %144 = vector.multi_reduction <add>, %143, %cst_92 [0] : vector<16x128xf32> to vector<128xf32>
    %145 = vector.shape_cast %144 : vector<128xf32> to vector<1x128xf32>
    %c0_93 = arith.constant 0 : index
    %c0_94 = arith.constant 0 : index
    %146 = vector.load %arg16[%c0_93, %c0_94] : memref<1x128xf32, #tpu.memory_space<vmem>>, vector<1x128xf32>
    tpu.vector_store %arg16[%c0_93, %c0_94], %145 {strides = array<i32>} : memref<1x128xf32, #tpu.memory_space<vmem>>, vector<1x128xf32>,
    return
  }
}

</mosaic_0001>

<bundles_post_ra>
// kernel: graph_representation_forward.1
= control target key start
LH: loop header
LB: loop body
LE: loop exit
PB: predicated region body
PF: predicated region fallthrough
CT: control target
= control target key end

     0   :  { %s3166_s0 = inlined_call_operand.vmem [shape: f32[16,32], index: 0, kind: input, shape index: {}]   ;;  %s3167_s1 = inlined_call_operand.vmem [shape: f32[24,16], index: 1, kind: input, shape index: {}]   ;;  %s3168_s2 = inlined_call_operand.vmem [shape: bf16[24,16], index: 2, kind: input, shape index: {}]   ;;  %s3169_s3 = inlined_call_operand.vmem [shape: bf16[24,16], index: 3, kind: input, shape index: {}]   ;;  %s3170_s4 = inlined_call_operand.vmem [shape: f32[16,1], index: 4, kind: input, shape index: {}]   ;;  %s3171_s5 = inlined_call_operand.vmem [shape: f32[2,32,32], index: 5, kind: input, shape index: {}]   ;;  %s3172_s6 = inlined_call_operand.vmem [shape: f32[2,32,32], index: 6, kind: input, shape index: {}]   ;;  %s3173_s7 = inlined_call_operand.vmem [shape: f32[2,16,32], index: 7, kind: input, shape index: {}]   ;;  %s3174_s8 = inlined_call_operand.hbm [shape: f32[2,1,32], index: 8, kind: input, shape index: {}]   ;;  %s3175_s9 = inlined_call_operand.vmem [shape: f32[2,32,32], index: 9, kind: input, shape index: {}]   ;;  %s3176_s10 = inlined_call_operand.hbm [shape: f32[2,1,32], index: 10, kind: input, shape index: {}]   ;;  %s3177_s11 = inlined_call_operand.vmem [shape: f32[2,32,128], index: 11, kind: input, shape index: {}]   ;;  %s3178_s12 = inlined_call_operand.hbm [shape: f32[2,32,128], index: 12, kind: input, shape index: {}]   ;;  %s3179_s13 = inlined_call_operand.vmem [shape: f32[2,1,128], index: 13, kind: input, shape index: {}]   ;;  %s3180_s14 = inlined_call_operand.vmem [shape: f32[32,256], index: 14, kind: input, shape index: {}]   ;;  %s3181_s15 = inlined_call_operand.vmem [shape: f32[1,256], index: 15, kind: input, shape index: {}]   ;;  %s3182_s16 = inlined_call_operand.vmem [shape: f32[1,128], index: 16, kind: output, shape index: {}]  }
   0x1   :  { %3184 = sst [smem:[#allocation9_spill]] %s3166_s0 }
   0x2   :  { %21 = vsyncpa [#allocation3], 0 }
   0x3   :  { %22 = vsyncpa [#allocation5], 0  ;;  %s2630_s21 = smov [#allocation4]   ;;  %s2631_s23 = smov [#allocation2]  }
   0x4   :  { %s58_s22 = sshll.u32 %s2630_s21, 4  ;;  %s44_s24 = sshll.u32 %s2631_s23, 4  ;;  %s59_s22 = int_to_ptr.vmem [resolvable:$true] %s58_s22  ;;  %s2728_s24 = int_to_ptr.vmem [resolvable:$true] %s44_s24 }
   0x5   :  { %s2560_s27 = scalar_lea.hbm %s3176_s10, 32 }
   0x6   :  { %p2561_p0 = scmp.ne.s32.totalorder %s3176_s10, %s2560_s27  ;;  %p2564_p1 = scmp.lt.u32.totalorder %s2560_s27, %s3176_s10 }
   0x8   :  { %p2566_p2 = pnand %p2564_p1, %p2561_p0 }
   0xa   :  { %2569 = shalt.err (!%p2566_p2)
}
   0xb   :  { %s2570_s17 = scalar_lea.vmem %s59_s22, 32  ;;  %p2575_p4 = scmp.lt.s32.totalorder %s59_s22, %s59_s22 }
   0xc   :  { %p2571_p3 = scmp.ne.s32.totalorder %s59_s22, %s2570_s17  ;;  %p2576_p5 = scmp.lt.s32.totalorder %s2570_s17, %s2570_s17 }
   0xe   :  { %p2577_p6 = por %p2576_p5, %p2575_p4 }
  0x10   :  { %p2578_p7 = pnand %p2577_p6, %p2571_p3 }
  0x12   :  { %2581 = shalt.err (!%p2578_p7)
}
  0x13   :  { %s2632_s18 = smov 16   ;;  %s2633_s19 = smov 1  }
  0x14   :  { %64 = dma.hbm_to_vmem [thread:$0]  %s3176_s10, 32, %s59_s22, [#allocation5], %s2632_s18, %s2632_s18, %s2633_s19  }
  0x15   :  { %s2582_s26 = scalar_lea.hbm %s3174_s8, 32 }
  0x16   :  { %p2583_p8 = scmp.ne.s32.totalorder %s3174_s8, %s2582_s26  ;;  %p2586_p9 = scmp.lt.u32.totalorder %s2582_s26, %s3174_s8 }
  0x18   :  { %p2588_p10 = pnand %p2586_p9, %p2583_p8 }
  0x1a   :  { %2591 = shalt.err (!%p2588_p10)
}
  0x1b   :  { %s2592_s0 = scalar_lea.vmem %s2728_s24, 32  ;;  %p2597_p12 = scmp.lt.s32.totalorder %s2728_s24, %s2728_s24 }
  0x1c   :  { %p2593_p11 = scmp.ne.s32.totalorder %s2728_s24, %s2592_s0  ;;  %p2598_p13 = scmp.lt.s32.totalorder %s2592_s0, %s2592_s0 }
  0x1e   :  { %p2599_p0 = por %p2598_p13, %p2597_p12 }
  0x20   :  { %p2600_p1 = pnand %p2599_p0, %p2593_p11 }
  0x22   :  { %2603 = shalt.err (!%p2600_p1)
}
  0x23   :  { %50 = dma.hbm_to_vmem [thread:$0]  %s3174_s8, 32, %s2728_s24, [#allocation3], %s2632_s18, %s2632_s18, %s2633_s19  }
  0x24   :  { %s2634_s17 = smov [#allocation6]   ;;  %s2604_s25 = scalar_lea.hbm %s3178_s12, 1024 }
  0x25   :  { %s72_s20 = sshll.u32 %s2634_s17, 4  ;;  %p2605_p2 = scmp.ne.s32.totalorder %s3178_s12, %s2604_s25  ;;  %s73_s20 = int_to_ptr.vmem [resolvable:$true] %s72_s20 }
  0x26   :  { %p2608_p3 = scmp.lt.u32.totalorder %s2604_s25, %s3178_s12 }
  0x28   :  { %p2610_p4 = pnand %p2608_p3, %p2605_p2 }
  0x2a   :  { %2613 = shalt.err (!%p2610_p4)
}
  0x2b   :  { %s2614_s30 = scalar_lea.vmem %s73_s20, 1024  ;;  %p2619_p6 = scmp.lt.s32.totalorder %s73_s20, %s73_s20 }
  0x2c   :  { %p2615_p5 = scmp.ne.s32.totalorder %s73_s20, %s2614_s30  ;;  %p2620_p7 = scmp.lt.s32.totalorder %s2614_s30, %s2614_s30 }
  0x2e   :  { %p2621_p8 = por %p2620_p7, %p2619_p6 }
  0x30   :  { %p2622_p9 = pnand %p2621_p8, %p2615_p5 }
  0x32   :  { %2625 = shalt.err (!%p2622_p9)
}
  0x33   :  { %s2635_s8 = smov 128   ;;  %s2636_s24 = smov 8  }
  0x34   :  { %78 = dma.hbm_to_vmem [thread:$0]  %s3178_s12, 1024, %s73_s20, [#allocation5], %s2635_s8, %s2635_s8, %s2636_s24  }
  0x35   :  { %2626 = dma.done.wait [#allocation3], 32  }
  0x36   :  { %2627 = vsyncadd [#allocation3], 4294967264 }
  0x37   :  { %2628 = dma.done.wait [#allocation5], 1056  }
  0x38   :  { %2629 = vsyncadd [#allocation5], 4294966240  ;;  %v143_v0 = vld [vmem:[%s3171_s5] sm:$0xff]  ;;  %v144_v1 = vld [vmem:[%s3171_s5 + $0x8] sm:$0xff]  ;;  %vm147_vm0 = vcmask 261120   ;;  %s3185_s0 = sld [smem:[#allocation9_spill]] }
  0x39   :  { %v229_v2 = vld [vmem:[%s3172_s6] sm:$0xff]  ;;  %v2391_v3 = vpack.c.bf16 %v144_v1, %v143_v0  ;;  %v230_v4 = vld [vmem:[%s3172_s6 + $0x8] sm:$0xff]  ;;  %v145_v5 = vld [vmem:[%s3171_s5 + $0x10] sm:$0xff]  ;;  %v2637_v14 = vmov 0.0|0.0   ;;  %vm2638_vm1 = vmmov 0   ;;  %v2639_v16 = vmov 0.0  }
  0x3a   :  { %v146_v6 = vld [vmem:[%s3171_s5 + $0x18] sm:$0xff]  ;;  %v2399_v7 = vpack.c.bf16 %v230_v4, %v229_v2  ;;  %v231_v9 = vld [vmem:[%s3172_s6 + $0x10] sm:$0xff]  ;;  %v2064_v15 = vld [vmem:[%s3168_s2] sm:$0xff]   ;;  %vm308_vm2 = vcmask 130048   ;;  %vm694_vm3 = vcmask 195584   ;;  %s2640_s18 = smov 64  }
  0x3b   :  { %v2395_v8 = vpack.c.bf16 %v146_v6, %v145_v5  ;;  %v232_v10 = vld [vmem:[%s3172_s6 + $0x18] sm:$0xff]  ;;  %2392 = vmatprep.subr.bf16.mxu0 %v2391_v3  ;;  %v2822_v17 = vunpack.c.l.bf16 %v2064_v15  ;;  %v2825_v18 = vunpack.c.h.bf16 %v2064_v15  ;;  %v96_v19 = vld [vmem:[%s3168_s2 + $0x8] sm:$0xf]  ;;  %v2837_v24 = vld [vmem:[%s3169_s3] sm:$0xff]   ;;  %s2641_s19 = smov 32  }
  0x3c   :  { %v2403_v12 = vpack.c.bf16 %v232_v10, %v231_v9  ;;  %2400 = vmatprep.subr.bf16.mxu1 %v2399_v7  ;;  %2394 = vmatpush3.bf16.msra.mxu0 %v2391_v3  ;;  %v2831_v20 = vunpack.c.l.bf16 %v96_v19  ;;  %v487_v27 = vld [vmem:[%s3173_s7] sm:$0xff]  ;;  %v488_v28 = vld [vmem:[%s3173_s7 + $0x8] sm:$0xff]  ;;  %v2069_v30 = vunpack.c.l.bf16 %v2837_v24  ;;  %v2070_v32 = vunpack.c.h.bf16 %v2837_v24  ;;  %v2903_v37 = vld [vmem:[%s3167_s1 + $0x10] sm:$0xff] }
  0x3d   :  { %2402 = vmatpush3.bf16.msra.mxu1 %v2399_v7  ;;  %2396 = vmatprep.subr.bf16.mxu0 %v2395_v8  ;;  %v2414_v31 = vpack.c.bf16 %v488_v28, %v487_v27  ;;  %v2861_v33 = vld [vmem:[%s3169_s3 + $0x8] sm:$0xf]  ;;  %v2885_v35 = vld [vmem:[%s3167_s1] sm:$0xff]  ;;  %v596_v41 = vld [vmem:[%s3175_s9 + $0x10] sm:$0xff] }
  0x3e   :  { %v2798_v11 = vld [vmem:[%s3185_s0] sm:$0xff]  ;;  %2404 = vmatprep.subr.bf16.mxu1 %v2403_v12  ;;  %v2807_v13 = vld [vmem:[%s3185_s0 + $0x8] sm:$0xff]  ;;  %106 = vxpose.xlu0.b32.start [1/3] (short) (narrow) %v2822_v17, 16  ;;  %v105_v34 = vunpack.c.l.bf16 %v2861_v33  ;;  %v597_v42 = vld [vmem:[%s3175_s9 + $0x18] sm:$0xff] }
  0x3f   :  { %2181 = vmatprep.mubr.msk.f32.mxu0 %vm147_vm0, %v2798_v11  ;;  %2192 = vmatprep.mubr.msk.f32.mxu1 %vm147_vm0, %v2798_v11  ;;  %v2894_v36 = vld [vmem:[%s3167_s1 + $0x8] sm:$0xff]  ;;  %v594_v38 = vld [vmem:[%s3175_s9] sm:$0xff]  ;;  %v2420_v43 = vpack.c.bf16 %v597_v42, %v596_v41 }
  0x40   :  { %2398 = vmatpush3.bf16.msra.mxu0 %v2395_v8  ;;  %v595_v39 = vld [vmem:[%s3175_s9 + $0x8] sm:$0xff]  ;;  %v1999_v60 = vld [vmem:[#allocation2] ss:$0 sm:$0xff]  ;;  %v2000_v28 = vld [vmem:[#allocation4] ss:$0 sm:$0xff] }
  0x41   :  { %2406 = vmatpush3.bf16.msra.mxu1 %v2403_v12  ;;  %2407 = vmatprep.subr.bf16.mxu0 %v2637_v14  ;;  %v2417_v40 = vpack.c.bf16 %v595_v39, %v594_v38  ;;  %v780_v15 = vld [vmem:[#allocation6] sm:$0xff]  ;;  %v781_v19 = vld [vmem:[#allocation6 + $0x8] sm:$0xff] }
  0x42   :  { %2410 = vmatprep.subr.bf16.mxu1 %v2637_v14  ;;  %107 = vxpose.xlu0.b32.cont [2/3] (short) (narrow) %v2825_v18, 16 }
  0x43   :  { %2182 = vmatmul.mubr.msk.f32.vlgmr.msra.gmra.mrb[0].mxu0 %vm147_vm0, %v2807_v13 }
  0x44   :  { %2193 = vmatmul.mubr.msk.f32.vlgmr.msra.gmra.mrb[0].mxu1 %vm147_vm0, %v2807_v13  ;;  %2199 = vmatprep.mubr.msk.f32.mxu0 %vm2638_vm1, %v2639_v16 }
  0x45   :  { %2212 = vmatprep.mubr.msk.f32.mxu1 %vm2638_vm1, %v2639_v16 }
  0x46   :  { %108 = vxpose.xlu0.b32.end [3/3] (short) (narrow) %v2831_v20, 16 }
  0xbe   :  { %v2927_v12 = vpop.trf.xlu0 }
 0x116   :  { %v2183_v21 = vpop.f32.mrb[0].mxu0 }
 0x117   :  { %v2194_v22 = vpop.f32.mrb[0].mxu1  ;;  %v220_v23 = vpop.f32.mrb[1].mxu0 }
 0x118   :  { %v2411_v25 = vpack.c.bf16 %v2183_v21, %v220_v23  ;;  %v299_v26 = vpop.f32.mrb[1].mxu1  ;;  %v782_v21 = vld [vmem:[#allocation6 + $0x10] sm:$0xff]  ;;  %v783_v23 = vld [vmem:[#allocation6 + $0x18] sm:$0xff] }
 0x119   :  { %v2408_v29 = vpack.c.bf16 %v2194_v22, %v299_v26  ;;  %v2426_v22 = vpack.c.bf16 %v781_v19, %v780_v15 }
 0x11a   :  { %2412 = vmatpush3.bf16.msra.mxu1 %v2411_v25  ;;  %v2430_v25 = vpack.c.bf16 %v783_v23, %v782_v21 }
 0x11b   :  { %2409 = vmatpush3.bf16.msra.mxu0 %v2408_v29  ;;  %2416 = vmatprep.subr.bf16.mxu1 %v2637_v14 }
 0x11c   :  { %2413 = vmatprep.subr.bf16.mxu0 %v2637_v14 }
 0x11d   :  { %2213 = vmatmul.mubr.msk.f32.vlgmr.msra.gmra.mrb[2].mxu1 %vm308_vm2, %v2822_v17 }
 0x11e   :  { %2200 = vmatmul.mubr.msk.f32.vlgmr.msra.gmra.mrb[2].mxu0 %vm308_vm2, %v2069_v30  ;;  %2215 = vmatprep.mubr.msk.f32.mxu1 %vm2638_vm1, %v2639_v16 }
 0x11f   :  { %2202 = vmatprep.mubr.msk.f32.mxu0 %vm2638_vm1, %v2639_v16  ;;  %2415 = vmatpush3.bf16.msra.mxu0 %v2414_v31 }
 0x120   :  { %2418 = vmatpush3.bf16.msra.mxu1 %v2417_v40 }
 0x121   :  { %2216 = vmatmul.mubr.msk.f32.gmra.mrb[4].mxu1 %vm308_vm2, %v2825_v18  ;;  %2419 = vmatprep.subr.bf16.mxu1 %v2637_v14 }
 0x122   :  { %2203 = vmatmul.mubr.msk.f32.gmra.mrb[4].mxu0 %vm308_vm2, %v2070_v32  ;;  %2218 = vmatprep.mubr.msk.f32.mxu1 %vm2638_vm1, %v2639_v16 }
 0x123   :  { %2205 = vmatprep.mubr.msk.f32.mxu0 %vm2638_vm1, %v2639_v16 }
 0x124   :  { %2421 = vmatpush3.bf16.msra.mxu1 %v2420_v43 }
 0x125   :  { %2219 = vmatmul.mubr.msk.f32.gmra.mrb[6].mxu1 %vm308_vm2, %v2831_v20  ;;  %2427 = vmatprep.subr.bf16.mxu1 %v2426_v22 }
 0x126   :  { %2206 = vmatmul.mubr.msk.f32.gmra.mrb[6].mxu0 %vm308_vm2, %v105_v34  ;;  %2242 = vmatprep.mubr.msk.f32.mxu1 %vm2638_vm1, %v2639_v16 }
 0x127   :  { %2225 = vmatprep.mubr.msk.f32.mxu0 %vm2638_vm1, %v2639_v16 }
 0x12a   :  { %2226 = vmatmul.mubr.msk.f32.vlgmr.msra.gmra.mrb[8].mxu0 %vm308_vm2, %v2885_v35 }
 0x12b   :  { %2228 = vmatprep.mubr.msk.f32.mxu0 %vm2638_vm1, %v2639_v16 }
 0x12e   :  { %2229 = vmatmul.mubr.msk.f32.gmra.mrb[10].mxu0 %vm308_vm2, %v2894_v36 }
 0x12f   :  { %2231 = vmatprep.mubr.msk.f32.mxu0 %vm2638_vm1, %v2639_v16 }
 0x132   :  { %2232 = vmatmul.mubr.msk.f32.gmra.mrb[12].mxu0 %vm308_vm2, %v2903_v37 }
 0x133   :  { %2257 = vmatprep.mubr.msk.f32.mxu0 %vm694_vm3, %v2927_v12 }
 0x1f0   :  { %v473_v44 = vpop.f32.mrb[2].mxu1 }
 0x1f1   :  { %v384_v45 = vpop.f32.mrb[2].mxu0  ;;  %v2214_v46 = vpop.f32.mrb[3].mxu1 }
 0x1f2   :  { %v474_v47 = vadd.f32 %v473_v44, %v384_v45  ;;  %v2201_v48 = vpop.f32.mrb[3].mxu0  ;;  %v2931_v44 = vpop.trf.xlu0  ;;  %v776_v45 = vld [vmem:[%s3177_s11] sm:$0xff]  ;;  %v777_v46 = vld [vmem:[%s3177_s11 + $0x8] sm:$0xff] }
 0x1f3   :  { %v778_v48 = vld [vmem:[%s3177_s11 + $0x10] sm:$0xff] }
 0x1f4   :  { %v478_v49 = vpop.f32.mrb[4].mxu1 }
 0x1f5   :  { %v389_v50 = vpop.f32.mrb[4].mxu0  ;;  %v2217_v51 = vpop.f32.mrb[5].mxu1 }
 0x1f6   :  { %v479_v52 = vadd.f32 %v478_v49, %v389_v50  ;;  %v2204_v53 = vpop.f32.mrb[5].mxu0  ;;  %v779_v49 = vld [vmem:[%s3177_s11 + $0x18] sm:$0xff] }
 0x1f7   :  { %v2010_v53 = vld [vmem:[%s3179_s13] ss:$0 sm:$0xff] }
 0x1f8   :  { %v483_v54 = vpop.f32.mrb[6].mxu1 }
 0x1f9   :  { %v394_v55 = vpop.f32.mrb[6].mxu0  ;;  %v2220_v56 = vpop.f32.mrb[7].mxu1 }
 0x1fa   :  { %v484_v57 = vadd.f32 %v483_v54, %v394_v55  ;;  %v2207_v58 = vpop.f32.mrb[7].mxu0 }
 0x1fd   :  { %v564_v59 = vpop.f32.mrb[8].mxu0 }
 0x1fe   :  { %v578_v61 = vadd.f32 %v564_v59, %v474_v47  ;;  %v2227_v62 = vpop.f32.mrb[9].mxu0  ;;  %v2434_v47 = vpack.c.bf16 %v777_v46, %v776_v45 }
 0x200   :  { %v588_v63 = vadd.f32 %v1999_v60, %v578_v61  ;;  %v949_v61 = vlaneseq }
 0x201   :  { %v569_v0 = vpop.f32.mrb[10].mxu0 }
 0x202   :  { %v591_v1 = vmax.f32 %v588_v63, 0.0  ;;  %v579_v2 = vadd.f32 %v569_v0, %v479_v52  ;;  %v2230_v3 = vpop.f32.mrb[11].mxu0  ;;  %v2438_v52 = vpack.c.bf16 %v779_v49, %v778_v48  ;;  %v950_v63 = vand.u32 127, %v949_v61 }
 0x204   :  { %v589_v4 = vadd.f32 %v1999_v60, %v579_v2  ;;  %2243 = vmatmul.mubr.msk.f32.vlgmr.msra.gmra.mrb[8].mxu1 %vm147_vm0, %v591_v1  ;;  %vm951_vm4 = vcmp.ge.s32.totalorder %v950_v63, 64  ;;  %vm952_vm5 = vcmp.lt.s32.totalorder %v950_v63, 96 }
 0x205   :  { %v574_v5 = vpop.f32.mrb[12].mxu0  ;;  %2245 = vmatprep.mubr.msk.f32.mxu1 %vm2638_vm1, %v2639_v16  ;;  %2429 = vmatpush3.bf16.msra.mxu1 %v2426_v22  ;;  %vm2960_vm6 = vmand %vm951_vm4, %vm952_vm5 }
 0x206   :  { %v592_v6 = vmax.f32 %v589_v4, 0.0  ;;  %v580_v7 = vadd.f32 %v574_v5, %v484_v57  ;;  %v2233_v8 = vpop.f32.mrb[13].mxu0  ;;  %2431 = vmatprep.subr.bf16.mxu1 %v2430_v25 }
 0x208   :  { %v590_v9 = vadd.f32 %v1999_v60, %v580_v7  ;;  %2246 = vmatmul.mubr.msk.f32.gmra.mrb[10].mxu1 %vm147_vm0, %v592_v6 }
 0x209   :  { %2248 = vmatprep.mubr.msk.f32.mxu1 %vm2638_vm1, %v2639_v16  ;;  %2433 = vmatpush3.bf16.msra.mxu1 %v2430_v25 }
 0x20a   :  { %v593_v10 = vmax.f32 %v590_v9, 0.0  ;;  %2435 = vmatprep.subr.bf16.mxu1 %v2434_v47 }
 0x20c   :  { %2249 = vmatmul.mubr.msk.f32.gmra.mrb[12].mxu1 %vm147_vm0, %v593_v10 }
 0x2d7   :  { %v680_v26 = vpop.f32.mrb[8].mxu1 }
 0x2d8   :  { %v2244_v27 = vpop.f32.mrb[9].mxu1  ;;  %v681_v31 = vadd.f32 %v2000_v28, %v680_v26  ;;  %v2013_v26 = vld [vmem:[%s3171_s5 + $0x20] sm:$0xff] }
 0x2d9   :  { %v2014_v27 = vld [vmem:[%s3171_s5 + $0x28] sm:$0xff] }
 0x2db   :  { %v685_v29 = vpop.f32.mrb[10].mxu1 }
 0x2dc   :  { %v686_v38 = vadd.f32 %v2000_v28, %v685_v29  ;;  %v2247_v39 = vpop.f32.mrb[11].mxu1  ;;  %v2442_v29 = vpack.c.bf16 %v2014_v27, %v2013_v26 }
 0x2de   :  { %v2422_v40 = vpack.c.bf16 %v686_v38, %v681_v31  ;;  %v2016_v31 = vld [vmem:[%s3171_s5 + $0x38] sm:$0xff] }
 0x2df   :  { %v690_v41 = vpop.f32.mrb[12].mxu1 }
 0x2e0   :  { %v691_v42 = vadd.f32 %v2000_v28, %v690_v41  ;;  %v2250_v43 = vpop.f32.mrb[13].mxu1  ;;  %2423 = vmatprep.subr.bf16.mxu0 %v2422_v40  ;;  %v2015_v28 = vld [vmem:[%s3171_s5 + $0x30] sm:$0xff]  ;;  %v2019_v41 = vld [vmem:[%s3172_s6 + $0x20] sm:$0xff] }
 0x2e1   :  { %2425 = vmatpush3.bf16.msra.mxu0 %v2422_v40  ;;  %v2446_v38 = vpack.c.bf16 %v2016_v31, %v2015_v28 }
 0x2e2   :  { %2255 = vmatprep.subr.mxu0 %v691_v42 }
 0x2e5   :  { %2256 = vmatpush3.msra.mxu0 %v691_v42  ;;  %v2020_v42 = vld [vmem:[%s3172_s6 + $0x28] sm:$0xff] }
 0x2e6   :  { %2258 = vmatmul.mubr.msk.f32.vlgmr.msra.gmra.mrb[14].mxu0 %vm694_vm3, %v2931_v44  ;;  %2443 = vmatprep.subr.bf16.mxu0 %v2442_v29  ;;  %v2450_v43 = vpack.c.bf16 %v2020_v42, %v2019_v41  ;;  %v1617_v41 = vld [vmem:[#allocation6 + $0x20] sm:$0xff]  ;;  %v1618_v42 = vld [vmem:[#allocation6 + $0x28] sm:$0xff] }
 0x2e7   :  { %2445 = vmatpush3.bf16.msra.mxu0 %v2442_v29 }
 0x2e8   :  { %2447 = vmatprep.subr.bf16.mxu0 %v2446_v38 }
 0x2eb   :  { %2449 = vmatpush3.bf16.msra.mxu0 %v2446_v38 }
 0x2ec   :  { %2451 = vmatprep.subr.bf16.mxu0 %v2450_v43 }
 0x3b9   :  { %v2259_v50 = vpop.f32.mrb[14].mxu0 }
 0x3ba   :  { %v767_v51 = vpop.f32.mrb[15].mxu0 }
 0x3bb   :  { %2268 = vmatprep.mubr.msk.f32.mxu1 %vm147_vm0, %v767_v51  ;;  %v2022_v51 = vld [vmem:[%s3172_s6 + $0x38] sm:$0xff] }
 0x3bc   :  { %2269 = vmatmul.mubr.msk.f32.vlgmr.msra.gmra.mrb[14].mxu1 %vm147_vm0, %v2259_v50  ;;  %v2021_v50 = vld [vmem:[%s3172_s6 + $0x30] sm:$0xff] }
 0x3bd   :  { %2437 = vmatpush3.bf16.msra.mxu1 %v2434_v47  ;;  %2279 = vmatprep.mubr.msk.f32.mxu1 %vm147_vm0, %v2798_v11 }
 0x3be   :  { %2439 = vmatprep.subr.bf16.mxu1 %v2438_v52 }
 0x3c1   :  { %2441 = vmatpush3.bf16.msra.mxu1 %v2438_v52  ;;  %v2454_v52 = vpack.c.bf16 %v2022_v51, %v2021_v50  ;;  %v2041_v51 = vld [vmem:[#allocation4 + $0x1] ss:$0 sm:$0xff] }
 0x3c2   :  { %2458 = vmatprep.subr.bf16.mxu1 %v2637_v14 }
 0x3c4   :  { %2280 = vmatmul.mubr.msk.f32.vlgmr.msra.gmra.mrb[14].mxu1 %vm147_vm0, %v2807_v13 }
 0x3c5   :  { %2308 = vmatprep.mubr.msk.f32.mxu1 %vm2638_vm1, %v2639_v16 }
 0x497   :  { %v2281_v54 = vpop.f32.mrb[14].mxu1 }
 0x498   :  { %v948_v55 = vadd.f32 %v2281_v54, %v2010_v53  ;;  %v931_v56 = vpop.f32.mrb[15].mxu1 }
 0x499   :  { %v947_v57 = vadd.f32 %v2010_v53, %v931_v56 }
 0x49a   :  { %v2012_v58 = vmul.f32 -1.442695, %v948_v55 }
 0x49b   :  { %v2011_v11 = vmul.f32 -1.442695, %v947_v57 }
 0x49c   :  { %2520 = vpow2.f32 %v2012_v58 }
 0x49d   :  { %2522 = vpow2.f32 %v2011_v11  ;;  %v2031_v11 = vld [vmem:[%s3173_s7 + $0x10] sm:$0xff] }
 0x49e   :  { %2524 = vtanh.f32 %v947_v57 }
 0x4a6   :  { %v2521_v59 = vpop.eup %2520 }
 0x4a7   :  { %v2523_v60 = vpop.eup %2522  ;;  %v963_v62 = vadd.f32 1.0, %v2521_v59  ;;  %v2032_v59 = vld [vmem:[%s3173_s7 + $0x18] sm:$0xff] }
 0x4a8   :  { %v962_v13 = vadd.f32 1.0, %v2523_v60  ;;  %v2525_v1 = vpop.eup %2524 }
 0x4aa   :  { %2526 = vrcp.f32 %v962_v13 }
 0x4ab   :  { %2528 = vrcp.f32 %v963_v62 }
 0x4ac   :  { %2530 = vtanh.f32 %v948_v55 }
 0x4b4   :  { %v2527_v2 = vpop.eup %2526 }
 0x4b5   :  { %v968_v3 = vsel %vm2960_vm6, %v2525_v1, %v2527_v2  ;;  %v2529_v4 = vpop.eup %2528 }
 0x4b6   :  { %974 = vrot.lane.b32.xlu1 %v968_v3, %s2640_s18  ;;  %v2531_v5 = vpop.eup %2530  ;;  %v970_v15 = vmul.f32 0.0, %v968_v3 }
 0x4b7   :  { %v969_v6 = vsel %vm2960_vm6, %v2531_v5, %v2529_v4 }
 0x4b8   :  { %v971_v22 = vmul.f32 0.0, %v969_v6 }
 0x4ba   :  { %976 = vrot.lane.b32.xlu1 %v969_v6, %s2640_s18 }
 0x528   :  { %v975_v7 = vpop.permute.xlu1 %974 }
 0x529   :  { %v980_v8 = vmul.f32 %v975_v7, %v968_v3 }
 0x52b   :  { %984 = vrot.lane.b32.xlu1 %v980_v8, %s2641_s19  ;;  %v2036_v8 = vld [vmem:[#allocation2 + $0x1] ss:$0 sm:$0xff] }
 0x52c   :  { %v977_v9 = vpop.permute.xlu1 %976 }
 0x52d   :  { %v981_v10 = vmul.f32 %v977_v9, %v969_v6 }
 0x52f   :  { %986 = vrot.lane.b32.xlu0 %v981_v10, %s2641_s19 }
 0x59d   :  { %v985_v19 = vpop.permute.xlu1 %984 }
 0x59e   :  { %v2972_v21 = vadd.f32 %v985_v19, %v970_v15 }
 0x5a0   :  { %2532 = vtanh.f32 %v2972_v21 }
 0x5a1   :  { %v987_v23 = vpop.permute.xlu0 %986 }
 0x5a2   :  { %v2975_v25 = vadd.f32 %v987_v23, %v971_v22 }
 0x5a4   :  { %2534 = vtanh.f32 %v2975_v25 }
 0x5aa   :  { %v2533_v39 = vpop.eup %2532 }
 0x5ab   :  { %996 = vrot.lane.b32.xlu1 %v2533_v39, %s2640_s18 }
 0x5ae   :  { %v2535_v40 = vpop.eup %2534 }
 0x5af   :  { %998 = vrot.lane.b32.xlu1 %v2535_v40, %s2640_s18 }
 0x61d   :  { %v997_v45 = vpop.permute.xlu1 %996 }
 0x61e   :  { %v1002_v46 = vmul.f32 %v997_v45, %v968_v3  ;;  %v2477_v45 = vpack.c.bf16 %v1618_v42, %v1617_v41  ;;  %v1843_v41 = vld [vmem:[%s3180_s14 + $0x30] sm:$0xff] }
 0x620   :  { %1011 = vrot.lane.b32.xlu1 %v1002_v46, %s2641_s19  ;;  %v1620_v46 = vld [vmem:[#allocation6 + $0x38] sm:$0xff] }
 0x621   :  { %v999_v47 = vpop.permute.xlu1 %998 }
 0x622   :  { %v1003_v48 = vmul.f32 %v999_v47, %v969_v6 }
 0x624   :  { %1013 = vrot.lane.b32.xlu1 %v1003_v48, %s2641_s19 }
 0x692   :  { %v3000_v49 = vpop.permute.xlu1 %1011 }
 0x693   :  { %2290 = vmatprep.mubr.msk.f32.mxu0 %vm147_vm0, %v3000_v49 }
 0x696   :  { %v3010_v53 = vpop.permute.xlu1 %1013 }
 0x697   :  { %2291 = vmatmul.mubr.msk.f32.vlgmr.msra.gmra.mrb[16].mxu0 %vm147_vm0, %v3010_v53 }
 0x698   :  { %2453 = vmatpush3.bf16.msra.mxu0 %v2450_v43  ;;  %2301 = vmatprep.mubr.msk.f32.mxu0 %vm147_vm0, %v3000_v49  ;;  %v1619_v43 = vld [vmem:[#allocation6 + $0x30] sm:$0xff] }
 0x699   :  { %2455 = vmatprep.subr.bf16.mxu0 %v2454_v52  ;;  %v2481_v47 = vpack.c.bf16 %v1620_v46, %v1619_v43  ;;  %v2642_v46 = vmov 0  }
 0x69a   :  { %2518 = vset.pattern.permute.xlu1 %v2642_v46  ;;  %2519 = vset.pattern.permute.xlu0 %v2642_v46 }
 0x69c   :  { %2457 = vmatpush3.bf16.msra.mxu0 %v2454_v52 }
 0x69d   :  { %2461 = vmatprep.subr.bf16.mxu0 %v2637_v14 }
 0x69f   :  { %2302 = vmatmul.mubr.msk.f32.vlgmr.msra.gmra.mrb[18].mxu0 %vm147_vm0, %v3010_v53 }
 0x6a0   :  { %2321 = vmatprep.mubr.msk.f32.mxu0 %vm2638_vm1, %v2639_v16 }
 0x76a   :  { %v2292_v54 = vpop.f32.mrb[16].mxu0 }
 0x76b   :  { %v1085_v55 = vpop.f32.mrb[17].mxu0 }
 0x76c   :  { %v2462_v56 = vpack.c.bf16 %v2292_v54, %v1085_v55 }
 0x76e   :  { %2463 = vmatpush3.bf16.msra.mxu0 %v2462_v56 }
 0x76f   :  { %2467 = vmatprep.subr.bf16.mxu0 %v2637_v14 }
 0x771   :  { %2322 = vmatmul.mubr.msk.f32.vlgmr.msra.gmra.mrb[20].mxu0 %vm308_vm2, %v2822_v17  ;;  %v2465_v17 = vpack.c.bf16 %v2032_v59, %v2031_v11 }
 0x772   :  { %v2303_v57 = vpop.f32.mrb[18].mxu0  ;;  %2324 = vmatprep.mubr.msk.f32.mxu0 %vm2638_vm1, %v2639_v16 }
 0x773   :  { %v1165_v58 = vpop.f32.mrb[19].mxu0 }
 0x774   :  { %v2459_v60 = vpack.c.bf16 %v2303_v57, %v1165_v58 }
 0x775   :  { %2325 = vmatmul.mubr.msk.f32.gmra.mrb[22].mxu0 %vm308_vm2, %v2825_v18  ;;  %v2037_v18 = vld [vmem:[%s3175_s9 + $0x20] sm:$0xff] }
 0x776   :  { %2460 = vmatpush3.bf16.msra.mxu1 %v2459_v60  ;;  %2327 = vmatprep.mubr.msk.f32.mxu0 %vm2638_vm1, %v2639_v16  ;;  %v2047_v60 = vld [vmem:[%s3177_s11 + $0x20] sm:$0xff] }
 0x777   :  { %2464 = vmatprep.subr.bf16.mxu1 %v2637_v14 }
 0x779   :  { %2309 = vmatmul.mubr.msk.f32.vlgmr.msra.gmra.mrb[16].mxu1 %vm308_vm2, %v2069_v30  ;;  %2328 = vmatmul.mubr.msk.f32.gmra.mrb[24].mxu0 %vm308_vm2, %v2831_v20  ;;  %v2038_v20 = vld [vmem:[%s3175_s9 + $0x28] sm:$0xff]  ;;  %v2039_v30 = vld [vmem:[%s3175_s9 + $0x30] sm:$0xff] }
 0x77a   :  { %2311 = vmatprep.mubr.msk.f32.mxu1 %vm2638_vm1, %v2639_v16  ;;  %2466 = vmatpush3.bf16.msra.mxu1 %v2465_v17  ;;  %v2468_v24 = vpack.c.bf16 %v2038_v20, %v2037_v18  ;;  %v2048_v17 = vld [vmem:[%s3177_s11 + $0x28] sm:$0xff]  ;;  %v2049_v20 = vld [vmem:[%s3177_s11 + $0x30] sm:$0xff] }
 0x77b   :  { %2351 = vmatprep.mubr.msk.f32.mxu0 %vm2638_vm1, %v2639_v16  ;;  %v2485_v18 = vpack.c.bf16 %v2048_v17, %v2047_v60 }
 0x77c   :  { %2469 = vmatpush3.bf16.msra.mxu0 %v2468_v24 }
 0x77d   :  { %2312 = vmatmul.mubr.msk.f32.gmra.mrb[18].mxu1 %vm308_vm2, %v2070_v32  ;;  %2470 = vmatprep.subr.bf16.mxu0 %v2637_v14  ;;  %v2040_v32 = vld [vmem:[%s3175_s9 + $0x38] sm:$0xff] }
 0x77e   :  { %2314 = vmatprep.mubr.msk.f32.mxu1 %vm2638_vm1, %v2639_v16  ;;  %v2471_v33 = vpack.c.bf16 %v2040_v32, %v2039_v30 }
 0x780   :  { %2472 = vmatpush3.bf16.msra.mxu0 %v2471_v33  ;;  %v2056_v33 = vld [vmem:[%s3179_s13 + $0x1] ss:$0 sm:$0xff] }
 0x781   :  { %2315 = vmatmul.mubr.msk.f32.gmra.mrb[20].mxu1 %vm308_vm2, %v105_v34  ;;  %2478 = vmatprep.subr.bf16.mxu0 %v2477_v45 }
 0x782   :  { %2334 = vmatprep.mubr.msk.f32.mxu1 %vm2638_vm1, %v2639_v16 }
 0x785   :  { %2335 = vmatmul.mubr.msk.f32.vlgmr.msra.gmra.mrb[22].mxu1 %vm308_vm2, %v2885_v35 }
 0x786   :  { %2337 = vmatprep.mubr.msk.f32.mxu1 %vm2638_vm1, %v2639_v16 }
 0x789   :  { %2338 = vmatmul.mubr.msk.f32.gmra.mrb[24].mxu1 %vm308_vm2, %v2894_v36 }
 0x78a   :  { %2340 = vmatprep.mubr.msk.f32.mxu1 %vm2638_vm1, %v2639_v16 }
 0x78d   :  { %2341 = vmatmul.mubr.msk.f32.gmra.mrb[26].mxu1 %vm308_vm2, %v2903_v37 }
 0x78e   :  { %2366 = vmatprep.mubr.msk.f32.mxu1 %vm694_vm3, %v2927_v12 }
 0x844   :  { %v1320_v34 = vpop.f32.mrb[20].mxu0 }
 0x845   :  { %v2323_v35 = vpop.f32.mrb[21].mxu0 }
 0x848   :  { %v1325_v36 = vpop.f32.mrb[22].mxu0 }
 0x849   :  { %v2326_v37 = vpop.f32.mrb[23].mxu0 }
 0x84c   :  { %v1240_v12 = vpop.f32.mrb[16].mxu1  ;;  %v1330_v62 = vpop.f32.mrb[24].mxu0 }
 0x84d   :  { %v1321_v13 = vadd.f32 %v1320_v34, %v1240_v12  ;;  %v2310_v63 = vpop.f32.mrb[17].mxu1  ;;  %v2329_v1 = vpop.f32.mrb[25].mxu0 }
 0x850   :  { %v1245_v14 = vpop.f32.mrb[18].mxu1 }
 0x851   :  { %v1326_v2 = vadd.f32 %v1325_v36, %v1245_v14  ;;  %v2313_v3 = vpop.f32.mrb[19].mxu1 }
 0x854   :  { %v1250_v4 = vpop.f32.mrb[20].mxu1 }
 0x855   :  { %v1331_v5 = vadd.f32 %v1330_v62, %v1250_v4  ;;  %v2316_v6 = vpop.f32.mrb[21].mxu1 }
 0x858   :  { %v1403_v7 = vpop.f32.mrb[22].mxu1 }
 0x859   :  { %v1417_v9 = vadd.f32 %v1403_v7, %v1321_v13  ;;  %v2336_v10 = vpop.f32.mrb[23].mxu1 }
 0x85b   :  { %v1428_v15 = vadd.f32 %v2036_v8, %v1417_v9 }
 0x85c   :  { %v1408_v19 = vpop.f32.mrb[24].mxu1 }
 0x85d   :  { %v1431_v22 = vmax.f32 %v1428_v15, 0.0  ;;  %v1418_v23 = vadd.f32 %v1408_v19, %v1326_v2  ;;  %v2339_v26 = vpop.f32.mrb[25].mxu1 }
 0x85e   :  { %v1838_v26 = vld [vmem:[%s3180_s14 + $0x8] sm:$0xff] }
 0x85f   :  { %v1429_v27 = vadd.f32 %v2036_v8, %v1418_v23  ;;  %2352 = vmatmul.mubr.msk.f32.vlgmr.msra.gmra.mrb[26].mxu0 %vm147_vm0, %v1431_v22 }
 0x860   :  { %v1413_v28 = vpop.f32.mrb[26].mxu1  ;;  %2354 = vmatprep.mubr.msk.f32.mxu0 %vm2638_vm1, %v2639_v16  ;;  %2480 = vmatpush3.bf16.msra.mxu0 %v2477_v45 }
 0x861   :  { %v1432_v29 = vmax.f32 %v1429_v27, 0.0  ;;  %v1419_v31 = vadd.f32 %v1413_v28, %v1331_v5  ;;  %v2342_v38 = vpop.f32.mrb[27].mxu1  ;;  %2482 = vmatprep.subr.bf16.mxu0 %v2481_v47  ;;  %v1840_v27 = vld [vmem:[%s3180_s14 + $0x18] sm:$0xff] }
 0x862   :  { %v2493_v28 = vpack.c.bf16 %v1840_v27, %v1838_v26 }
 0x863   :  { %v1430_v39 = vadd.f32 %v2036_v8, %v1419_v31  ;;  %2355 = vmatmul.mubr.msk.f32.gmra.mrb[28].mxu0 %vm147_vm0, %v1432_v29  ;;  %v1842_v29 = vld [vmem:[%s3180_s14 + $0x28] sm:$0xff]  ;;  %v1844_v31 = vld [vmem:[%s3180_s14 + $0x38] sm:$0xff] }
 0x864   :  { %2357 = vmatprep.mubr.msk.f32.mxu0 %vm2638_vm1, %v2639_v16  ;;  %2484 = vmatpush3.bf16.msra.mxu0 %v2481_v47 }
 0x865   :  { %v1433_v40 = vmax.f32 %v1430_v39, 0.0  ;;  %2486 = vmatprep.subr.bf16.mxu0 %v2485_v18  ;;  %v2497_v39 = vpack.c.bf16 %v1844_v31, %v1842_v29 }
 0x867   :  { %2358 = vmatmul.mubr.msk.f32.gmra.mrb[30].mxu0 %vm147_vm0, %v1433_v40  ;;  %v1841_v40 = vld [vmem:[%s3180_s14 + $0x20] sm:$0xff] }
 0x868   :  { %v2499_v42 = vpack.c.bf16 %v1843_v41, %v1841_v40 }
 0x932   :  { %v1522_v48 = vpop.f32.mrb[26].mxu0 }
 0x933   :  { %v2353_v50 = vpop.f32.mrb[27].mxu0  ;;  %v1523_v54 = vadd.f32 %v2041_v51, %v1522_v48 }
 0x936   :  { %v1527_v52 = vpop.f32.mrb[28].mxu0 }
 0x937   :  { %v1528_v55 = vadd.f32 %v2041_v51, %v1527_v52  ;;  %v2356_v56 = vpop.f32.mrb[29].mxu0 }
 0x939   :  { %v2473_v57 = vpack.c.bf16 %v1528_v55, %v1523_v54  ;;  %v1957_v54 = vld [vmem:[%s3170_s4 + $0x8] sm:$0xff] }
 0x93a   :  { %v1532_v58 = vpop.f32.mrb[30].mxu0 }
 0x93b   :  { %v1533_v11 = vadd.f32 %v2041_v51, %v1532_v58  ;;  %v2359_v59 = vpop.f32.mrb[31].mxu0  ;;  %2474 = vmatprep.subr.bf16.mxu1 %v2473_v57  ;;  %v1956_v51 = vld [vmem:[%s3170_s4] sm:$0xff] }
 0x93c   :  { %2476 = vmatpush3.bf16.msra.mxu1 %v2473_v57  ;;  %v1848_v57 = vshrl.u32 %v949_v61, 7 }
 0x93d   :  { %2364 = vmatprep.subr.mxu1 %v1533_v11 }
 0x93e   :  { %v1849_v58 = vsub.s32 0, %v1848_v57 }
 0x940   :  { %2365 = vmatpush3.msra.mxu1 %v1533_v11  ;;  %v1845_v11 = vld [vmem:[%s3181_s15] sm:$0x3] }
 0x941   :  { %2367 = vmatmul.mubr.msk.f32.vlgmr.msra.gmra.mrb[28].mxu1 %vm694_vm3, %v2931_v44  ;;  %v2050_v44 = vld [vmem:[%s3177_s11 + $0x38] sm:$0xff]  ;;  %2494 = vmatprep.subr.bf16.mxu1 %v2493_v28  ;;  %v1850_v59 = vrot.slane %v1845_v11, %v1849_v58 }
 0x942   :  { %1931 = vmatprep.mubr.f32.mxu1 %v2639_v16  ;;  %v2489_v32 = vpack.c.bf16 %v2050_v44, %v2049_v20 }
 0xa14   :  { %v2368_v24 = vpop.f32.mrb[28].mxu1 }
 0xa15   :  { %v1602_v30 = vpop.f32.mrb[29].mxu1 }
 0xa16   :  { %2377 = vmatprep.mubr.msk.f32.mxu0 %vm147_vm0, %v1602_v30 }
 0xa17   :  { %2378 = vmatmul.mubr.msk.f32.vlgmr.msra.gmra.mrb[32].mxu0 %vm147_vm0, %v2368_v24 }
 0xa18   :  { %2488 = vmatpush3.bf16.msra.mxu0 %v2485_v18  ;;  %2388 = vmatprep.mubr.msk.f32.mxu0 %vm147_vm0, %v3000_v49 }
 0xa19   :  { %2490 = vmatprep.subr.bf16.mxu0 %v2489_v32 }
 0xa1c   :  { %2492 = vmatpush3.bf16.msra.mxu0 %v2489_v32 }
 0xa1f   :  { %2389 = vmatmul.mubr.msk.f32.vlgmr.msra.gmra.mrb[32].mxu0 %vm147_vm0, %v3010_v53 }
 0xaf2   :  { %v2390_v34 = vpop.f32.mrb[32].mxu0 }
 0xaf3   :  { %v1786_v35 = vadd.f32 %v2390_v34, %v2056_v33  ;;  %v1768_v36 = vpop.f32.mrb[33].mxu0 }
 0xaf4   :  { %v1785_v37 = vadd.f32 %v2056_v33, %v1768_v36 }
 0xaf5   :  { %v2058_v12 = vmul.f32 -1.442695, %v1786_v35 }
 0xaf6   :  { %v2057_v62 = vmul.f32 -1.442695, %v1785_v37 }
 0xaf7   :  { %2536 = vpow2.f32 %v2058_v12 }
 0xaf8   :  { %2538 = vpow2.f32 %v2057_v62 }
 0xaf9   :  { %2540 = vtanh.f32 %v1785_v37 }
 0xb01   :  { %v2537_v13 = vpop.eup %2536 }
 0xb02   :  { %v2539_v63 = vpop.eup %2538  ;;  %v1796_v49 = vadd.f32 1.0, %v2537_v13 }
 0xb03   :  { %v1795_v1 = vadd.f32 1.0, %v2539_v63  ;;  %v2541_v53 = vpop.eup %2540 }
 0xb05   :  { %2542 = vrcp.f32 %v1795_v1 }
 0xb06   :  { %2544 = vrcp.f32 %v1796_v49 }
 0xb07   :  { %2546 = vtanh.f32 %v1786_v35  ;;  %v1853_v35 = vsub.s32 1, %v1848_v57 }
 0xb09   :  { %v1854_v36 = vrot.slane %v1845_v11, %v1853_v35 }
 0xb0f   :  { %v2543_v14 = vpop.eup %2542 }
 0xb10   :  { %v1801_v2 = vsel %vm2960_vm6, %v2541_v53, %v2543_v14  ;;  %v2545_v3 = vpop.eup %2544 }
 0xb11   :  { %1807 = vrot.lane.b32.xlu1 %v1801_v2, %s2640_s18  ;;  %v2547_v4 = vpop.eup %2546  ;;  %v1803_v10 = vmul.f32 %v1801_v2, %v2972_v21  ;;  %v1837_v21 = vld [vmem:[%s3180_s14] sm:$0xff] }
 0xb12   :  { %v1802_v5 = vsel %vm2960_vm6, %v2547_v4, %v2545_v3 }
 0xb13   :  { %v1804_v22 = vmul.f32 %v1802_v5, %v2975_v25  ;;  %v1839_v25 = vld [vmem:[%s3180_s14 + $0x10] sm:$0xff] }
 0xb14   :  { %v2495_v38 = vpack.c.bf16 %v1839_v25, %v1837_v21 }
 0xb15   :  { %1809 = vrot.lane.b32.xlu1 %v1802_v5, %s2640_s18 }
 0xb16   :  { %2496 = vmatpush1.bf16.msra.mxu1 %v2495_v38 }
 0xb17   :  { %2498 = vmatprep.subr.bf16.mxu1 %v2497_v39 }
 0xb1a   :  { %2500 = vmatpush1.bf16.msra.mxu1 %v2499_v42 }
 0xb83   :  { %v1808_v6 = vpop.permute.xlu1 %1807 }
 0xb84   :  { %v1813_v7 = vmul.f32 %v1808_v6, %v1801_v2 }
 0xb86   :  { %1817 = vrot.lane.b32.xlu1 %v1813_v7, %s2641_s19 }
 0xb87   :  { %v1810_v8 = vpop.permute.xlu1 %1809 }
 0xb88   :  { %v1814_v9 = vmul.f32 %v1810_v8, %v1802_v5 }
 0xb8a   :  { %1819 = vrot.lane.b32.xlu1 %v1814_v9, %s2641_s19 }
 0xbf8   :  { %v1818_v15 = vpop.permute.xlu1 %1817 }
 0xbf9   :  { %v1823_v19 = vadd.f32 %v1818_v15, %v1803_v10 }
 0xbfb   :  { %2548 = vtanh.f32 %v1823_v19 }
 0xbfc   :  { %v1820_v23 = vpop.permute.xlu1 %1819 }
 0xbfd   :  { %v1824_v0 = vadd.f32 %v1820_v23, %v1804_v22 }
 0xbff   :  { %2550 = vtanh.f32 %v1824_v0 }
 0xc05   :  { %v2549_v43 = vpop.eup %2548 }
 0xc06   :  { %1829 = vrot.lane.b32.xlu1 %v2549_v43, %s2640_s18 }
 0xc09   :  { %v2551_v45 = vpop.eup %2550 }
 0xc0a   :  { %1831 = vrot.lane.b32.xlu1 %v2551_v45, %s2640_s18 }
 0xc78   :  { %v1830_v47 = vpop.permute.xlu1 %1829 }
 0xc79   :  { %v1835_v48 = vmul.f32 %v1830_v47, %v1801_v2 }
 0xc7b   :  { %1859 = vrot.lane.b32.xlu1 %v1835_v48, %s2641_s19 }
 0xc7c   :  { %v1832_v50 = vpop.permute.xlu1 %1831 }
 0xc7d   :  { %v1836_v52 = vmul.f32 %v1832_v50, %v1802_v5 }
 0xc7f   :  { %1861 = vrot.lane.b32.xlu0 %v1836_v52, %s2641_s19  ;;  %1960 = vperm.xlu1 %2518, %v1956_v51  }
 0xc83   :  { %1965 = vperm.xlu0 %2519, %v1957_v54  }
 0xced   :  { %v1860_v55 = vpop.permute.xlu1 %1859 }
 0xcee   :  { %2059 = vmatmul.mubr.msk.f32.vlgmr.msra.gmra.mrb[30].mxu1 %vm147_vm0, %v1860_v55 }
 0xcef   :  { %1937 = vmatprep.mubr.f32.mxu1 %v2639_v16 }
 0xcf1   :  { %v1862_v56 = vpop.permute.xlu0 %1861 }
 0xcf2   :  { %2060 = vmatmul.mubr.msk.f32.gmra.mrb[32].mxu1 %vm147_vm0, %v1862_v56 }
 0xcfe   :  { %v1961_v37 = vpop.permute.xlu1 %1960 }
 0xd02   :  { %v1966_v63 = vpop.permute.xlu0 %1965 }
 0xdc1   :  { %v1933_v60 = vpop.f32.mrb[30].mxu1 }
 0xdc2   :  { %v1934_v17 = vadd.f32 %v1933_v60, %v1850_v59  ;;  %v1935_v18 = vpop.f32.mrb[31].mxu1 }
 0xdc3   :  { %v1936_v62 = vadd.f32 %v1935_v18, %v1854_v36 }
 0xdc4   :  { %v2061_v20 = vmul.f32 -1.442695, %v1934_v17 }
 0xdc5   :  { %v1939_v44 = vpop.f32.mrb[32].mxu1 }
 0xdc6   :  { %2552 = vpow2.f32 %v2061_v20  ;;  %v1940_v24 = vadd.f32 %v1939_v44, %v1850_v59  ;;  %v1941_v30 = vpop.f32.mrb[33].mxu1 }
 0xdc7   :  { %v1942_v53 = vadd.f32 %v1941_v30, %v1854_v36 }
 0xdc8   :  { %v2062_v16 = vmul.f32 -1.442695, %v1940_v24 }
 0xdca   :  { %2554 = vpow2.f32 %v2062_v16 }
 0xdd0   :  { %v2553_v32 = vpop.eup %2552 }
 0xdd1   :  { %v1950_v33 = vadd.f32 1.0, %v2553_v32 }
 0xdd3   :  { %2556 = vrcp.f32 %v1950_v33 }
 0xdd4   :  { %v2555_v61 = vpop.eup %2554 }
 0xdd5   :  { %v1951_v34 = vadd.f32 1.0, %v2555_v61 }
 0xdd7   :  { %2558 = vrcp.f32 %v1951_v34 }
 0xddd   :  { %v2557_v12 = vpop.eup %2556 }
 0xdde   :  { %v1968_v13 = vmul.f32 %v2557_v12, %v1961_v37 }
 0xde0   :  { %v1970_v49 = vmul.f32 %v1968_v13, %v1936_v62 }
 0xde1   :  { %v2559_v1 = vpop.eup %2558 }
 0xde2   :  { %v1969_v14 = vmul.f32 %v2559_v1, %v1966_v63 }
 0xde4   :  { %v1971_v2 = vmul.f32 %v1969_v14, %v1942_v53 }
 0xde6   :  { %v1972_v3 = vadd.f32 %v1971_v2, %v1970_v49 }
 0xde8   :  { %v1973_v4 = vrot.slane %v1972_v3, 4 }
 0xdea   :  { %v1974_v5 = vadd.f32 %v1973_v4, %v1972_v3 }
 0xdec   :  { %v1975_v6 = vrot.slane %v1974_v5, 2 }
 0xdee   :  { %v1976_v7 = vadd.f32 %v1975_v6, %v1974_v5 }
 0xdf0   :  { %v1977_v8 = vrot.slane %v1976_v7, 1 }
 0xdf2   :  { %v1978_v9 = vadd.f32 %v1977_v8, %v1976_v7 }
 0xdf4   :  { %1979 = vst [vmem:[%s3182_s16] sm:$0x1] %v1978_v9 }
 0xdf5   :  { %1984 = vsyncpa [#allocation3], 1 }
 0xdf6   :  { %1985 = vsyncpa [#allocation5], 1 }

</bundles_post_ra>
